<compile_context>
chip_gen: v7x
topology: tpu7x:2x2x1
jax: 0.10.0
libtpu: 0.0.40
codegen_flags: <defaults>
</compile_context>

<pallas_src>
import functools

import jax
import jax.numpy as jnp
from jax import lax
from jax.experimental import pallas as pl
from jax.experimental.pallas import tpu as pltpu

_VMEM_LIMIT = 32 * 1024 * 1024  # comfortable on v5e/v6e (128 MiB) and v7x (64 MiB)


def _conv_stats_kernel(xw_ref, w_ref, y_ref, stats_ref, *, H, W):
    """Pass 1: parity-packed transposed conv for one sample + BN partial stats.

    xw_ref   : (1, (H+2)*W, 3*Cin)  channels-last, W-shifted, H-padded input rows
    w_ref    : (3, 3*Cin, 4*Cout)   regrouped ConvTranspose2d weights
    y_ref    : (1, H*W, 4*Cout)     raw conv output, 4 parities packed on lanes
    stats_ref: (1, 2, 4*Cout)       row 0 = sum(y), row 1 = sum(y*y)
    """
    HW = H * W
    # 3 MXU matmuls (one per H-shift row group); f32 accumulation, default precision.
    y = jnp.dot(xw_ref[0, 0:HW, :], w_ref[0], preferred_element_type=jnp.float32)
    for a in range(1, 3):
        y = y + jnp.dot(xw_ref[0, a * W:a * W + HW, :], w_ref[a],
                        preferred_element_type=jnp.float32)
    # Store the conv result exactly once (no VMEM write->read round trip).
    y_ref[0] = y
    # Single-pass BatchNorm statistics per lane column (= per (parity, channel)).
    stats_ref[0, 0:1, :] = jnp.sum(y, axis=0, keepdims=True)
    stats_ref[0, 1:2, :] = jnp.sum(y * y, axis=0, keepdims=True)


def _bn_relu_kernel(y_ref, scale_ref, shift_ref, out_ref):
    """Pass 2: y * scale + shift, ReLU.  Output aliases y (in place)."""
    out_ref[0] = jnp.maximum(y_ref[0] * scale_ref[...] + shift_ref[...], 0.0)


def _pack_weights(weight, Cin, Cout):
    """(Cin, Cout, 4, 4) ConvTranspose2d weight -> (3, 3*Cin, 4*Cout) block matrix.

    Row group a = H-shift, row b*Cin+ci = (W-shift, in-channel),
    column (2p+s)*Cout+co = (output parity, out-channel).
    """
    wp = jnp.zeros((3, 3, Cin, 4, Cout), jnp.float32)
    for a in range(3):
        for b in range(3):
            for p in range(2):
                for s in range(2):
                    dh, dw = a - p, b - s
                    if dh in (0, 1) and dw in (0, 1):
                        kh, kw = 3 - p - 2 * dh, 3 - s - 2 * dw
                        wp = wp.at[a, b, :, 2 * p + s, :].set(weight[:, :, kh, kw])
    return wp.reshape(3, 3 * Cin, 4 * Cout)


@functools.partial(jax.jit, static_argnames=("eps",))
def g_block_forward(x_nchw, weight, gamma, beta, eps=1e-5):
    """Forward pass of G_block.

    x_nchw : (N, Cin, H, W)      float32   (PyTorch NCHW convention)
    weight : (Cin, Cout, 4, 4)   float32   (PyTorch ConvTranspose2d weight layout)
    gamma  : (Cout,)             float32   BatchNorm scale
    beta   : (Cout,)             float32   BatchNorm shift
    returns: (N, Cout, 2H, 2W)   float32
    """
    N, Cin, H, W = x_nchw.shape
    Cout = weight.shape[1]
    HW = H * W
    C4 = 4 * Cout

    # ---- cheap XLA glue: channels-last, pad by 1, materialize the 3 W-shifts ----
    x = jnp.transpose(x_nchw, (0, 2, 3, 1)).astype(jnp.float32)       # NHWC
    xpad = jnp.pad(x, ((0, 0), (1, 1), (1, 1), (0, 0)))               # (N, H+2, W+2, Cin)
    xw = jnp.concatenate([xpad[:, :, b:b + W, :] for b in range(3)], axis=-1)
    xw = xw.reshape(N, (H + 2) * W, 3 * Cin)                          # (N, (H+2)*W, 3*Cin)

    wp = _pack_weights(weight.astype(jnp.float32), Cin, Cout)         # (3, 3*Cin, 4*Cout)

    # ---- pass 1: conv + per-sample BN partial statistics ----
    conv_kernel = functools.partial(_conv_stats_kernel, H=H, W=W)
    y_raw, stats = pl.pallas_call(
        conv_kernel,
        grid=(N,),
        in_specs=[
            pl.BlockSpec((1, (H + 2) * W, 3 * Cin), lambda n: (n, 0, 0)),
            pl.BlockSpec((3, 3 * Cin, C4), lambda n: (0, 0, 0)),
        ],
        out_specs=(
            pl.BlockSpec((1, HW, C4), lambda n: (n, 0, 0)),
            pl.BlockSpec((1, 2, C4), lambda n: (n, 0, 0)),
        ),
        out_shape=(
            jax.ShapeDtypeStruct((N, HW, C4), jnp.float32),
            jax.ShapeDtypeStruct((N, 2, C4), jnp.float32),
        ),
        compiler_params=pltpu.CompilerParams(
            dimension_semantics=("parallel",),
            vmem_limit_bytes=_VMEM_LIMIT,
        ),
    )(xw, wp)

    # ---- tiny cross-sample / cross-parity BN reduction (O(Cout) work in XLA) ----
    tot = jnp.sum(stats, axis=0)                          # (2, 4*Cout)
    sum_c = jnp.sum(tot[0].reshape(4, Cout), axis=0)      # (Cout,)
    sumsq_c = jnp.sum(tot[1].reshape(4, Cout), axis=0)
    count = jnp.float32(N * 4 * H * W)                    # N * Ho * Wo
    mean = sum_c / count
    var = jnp.maximum(sumsq_c / count - mean * mean, 0.0)  # biased batch variance
    inv_std = lax.rsqrt(var + eps)
    scale_c = gamma.astype(jnp.float32) * inv_std
    shift_c = beta.astype(jnp.float32) - mean * scale_c
    scale4 = jnp.tile(scale_c, 4).reshape(1, C4)           # parity-major, matches y layout
    shift4 = jnp.tile(shift_c, 4).reshape(1, C4)

    # ---- pass 2: BatchNorm affine + ReLU, in place on the y buffer ----
    y = pl.pallas_call(
        _bn_relu_kernel,
        grid=(N,),
        in_specs=[
            pl.BlockSpec((1, HW, C4), lambda n: (n, 0, 0)),
            pl.BlockSpec((1, C4), lambda n: (0, 0)),
            pl.BlockSpec((1, C4), lambda n: (0, 0)),
        ],
        out_specs=pl.BlockSpec((1, HW, C4), lambda n: (n, 0, 0)),
        out_shape=jax.ShapeDtypeStruct((N, HW, C4), jnp.float32),
        input_output_aliases={0: 0},
        compiler_params=pltpu.CompilerParams(
            dimension_semantics=("parallel",),
            vmem_limit_bytes=_VMEM_LIMIT,
        ),
    )(y_raw, scale4, shift4)

    # ---- de-interleave parities and return to PyTorch NCHW ----
    y = y.reshape(N, H, W, 2, 2, Cout)            # (n, q, r, p, s, c)
    y = jnp.transpose(y, (0, 5, 1, 3, 2, 4))      # (n, c, q, p, r, s)
    return y.reshape(N, Cout, 2 * H, 2 * W)


def _reference_forward(x, weight, gamma, beta, eps=1e-5):
    """Pure-JAX reference: ConvTranspose2d via input-dilated conv + BN + ReLU."""
    w = jnp.flip(weight, axis=(2, 3))
    w = jnp.transpose(w, (1, 0, 2, 3))                    # (Cout, Cin, kH, kW)
    y = lax.conv_general_dilated(
        x, w, window_strides=(1, 1),
        padding=[(2, 2), (2, 2)],                         # k - 1 - p = 2
        lhs_dilation=(2, 2),
        dimension_numbers=("NCHW", "OIHW", "NCHW"),
        precision=lax.Precision.HIGHEST)
    mean = jnp.mean(y, axis=(0, 2, 3), keepdims=True)
    var = jnp.mean((y - mean) ** 2, axis=(0, 2, 3), keepdims=True)
    y = (y - mean) / jnp.sqrt(var + eps)
    y = y * gamma.reshape(1, -1, 1, 1) + beta.reshape(1, -1, 1, 1)
    return jnp.maximum(y, 0.0)


if __name__ == "__main__":
    key = jax.random.PRNGKey(0)
    kx, kw = jax.random.split(key)

    # Small shapes consistent with G_block(in_channels=3, out_channels=8)
    N, Cin, H, W, Cout = 2, 3, 16, 16, 8
    x = jax.random.normal(kx, (N, Cin, H, W), jnp.float32)
    weight = jax.random.normal(kw, (Cin, Cout, 4, 4), jnp.float32) * 0.1
    gamma = jnp.ones((Cout,), jnp.float32)    # BatchNorm2d default init
    beta = jnp.zeros((Cout,), jnp.float32)

    out = jax.block_until_ready(g_block_forward(x, weight, gamma, beta))
    assert out.shape == (N, Cout, 2 * H, 2 * W), out.shape

    ref = _reference_forward(x, weight, gamma, beta)
    abs_err = jnp.abs(out - ref)
    # Tolerance accounts for the bf16-input MXU path (Precision.HIGHEST was dropped
    # per the perf review) versus the f32 HIGHEST reference; outputs are BN-normalized O(1).
    max_err = float(jnp.max(abs_err))
    mean_err = float(jnp.mean(abs_err))
    assert max_err < 5e-2, ("max abs err", max_err)
    assert mean_err < 5e-3, ("mean abs err", mean_err)

    print("KERNEL_OK")
</pallas_src>

<mosaic_0001>
module attributes {stable_mosaic.version = 11 : i64} {
  func.func @_bn_relu_kernel(%arg0: i32, %arg1: memref<1x256x32xf32, #tpu.memory_space<vmem>>, %arg2: memref<1x32xf32, #tpu.memory_space<vmem>>, %arg3: memref<1x32xf32, #tpu.memory_space<vmem>>, %arg4: memref<1x256x32xf32, #tpu.memory_space<vmem>>) attributes {dimension_semantics = [#tpu.dimension_semantics<parallel>], iteration_bounds = array<i64: 2>, scalar_prefetch = 0 : i64, scratch_operands = 0 : i64, tpu.core_type = #tpu.core_type<tc>, window_params = [{transform_indices = @transform_0, window_bounds = array<i64: 1, 256, 32>}, {pipeline_mode = #tpu.pipeline_mode<synchronous>, transform_indices = @transform_1, window_bounds = array<i64: 1, 32>}, {pipeline_mode = #tpu.pipeline_mode<synchronous>, transform_indices = @transform_2, window_bounds = array<i64: 1, 32>}, {transform_indices = @transform_3, window_bounds = array<i64: 1, 256, 32>}]} {
    %c0 = arith.constant 0 : index
    %c0_0 = arith.constant 0 : index
    %c0_1 = arith.constant 0 : index
    %0 = vector.load %arg1[%c0, %c0_0, %c0_1] : memref<1x256x32xf32, #tpu.memory_space<vmem>>, vector<1x256x32xf32>
    %1 = vector.shape_cast %0 : vector<1x256x32xf32> to vector<256x32xf32>
    %c0_2 = arith.constant 0 : index
    %c0_3 = arith.constant 0 : index
    %2 = vector.load %arg2[%c0_2, %c0_3] : memref<1x32xf32, #tpu.memory_space<vmem>>, vector<1x32xf32>
    %3 = vector.broadcast %2 : vector<1x32xf32> to vector<256x32xf32>
    %4 = arith.mulf %1, %3 : vector<256x32xf32>
    %c0_4 = arith.constant 0 : index
    %c0_5 = arith.constant 0 : index
    %5 = vector.load %arg3[%c0_4, %c0_5] : memref<1x32xf32, #tpu.memory_space<vmem>>, vector<1x32xf32>
    %6 = vector.broadcast %5 : vector<1x32xf32> to vector<256x32xf32>
    %7 = arith.addf %4, %6 : vector<256x32xf32>
    %cst = arith.constant 0.000000e+00 : f32
    %8 = vector.broadcast %cst : f32 to vector<256x32xf32>
    %9 = arith.maximumf %7, %8 : vector<256x32xf32>
    %c0_6 = arith.constant 0 : index
    %c0_7 = arith.constant 0 : index
    %c0_8 = arith.constant 0 : index
    %10 = vector.load %arg4[%c0_6, %c0_7, %c0_8] : memref<1x256x32xf32, #tpu.memory_space<vmem>>, vector<1x256x32xf32>
    %11 = vector.shape_cast %10 : vector<1x256x32xf32> to vector<256x32xf32>
    %12 = vector.shape_cast %9 : vector<256x32xf32> to vector<1x256x32xf32>
    tpu.vector_store %arg4[%c0_6, %c0_7, %c0_8], %12 {strides = array<i32>} : memref<1x256x32xf32, #tpu.memory_space<vmem>>, vector<1x256x32xf32>,
    return
  }
  func.func @transform_0(%arg0: i32) -> (i32, i32, i32) {
    %c0_i32 = arith.constant 0 : i32
    %c0_i32_0 = arith.constant 0 : i32
    %c0_i32_1 = arith.constant 0 : i32
    return %arg0, %c0_i32, %c0_i32_0 : i32, i32, i32
  }
  func.func @transform_1(%arg0: i32) -> (i32, i32) {
    %c0_i32 = arith.constant 0 : i32
    %c0_i32_0 = arith.constant 0 : i32
    %c0_i32_1 = arith.constant 0 : i32
    return %c0_i32, %c0_i32_0 : i32, i32
  }
  func.func @transform_2(%arg0: i32) -> (i32, i32) {
    %c0_i32 = arith.constant 0 : i32
    %c0_i32_0 = arith.constant 0 : i32
    %c0_i32_1 = arith.constant 0 : i32
    return %c0_i32, %c0_i32_0 : i32, i32
  }
  func.func @transform_3(%arg0: i32) -> (i32, i32, i32) {
    %c0_i32 = arith.constant 0 : i32
    %c0_i32_0 = arith.constant 0 : i32
    %c0_i32_1 = arith.constant 0 : i32
    return %arg0, %c0_i32, %c0_i32_0 : i32, i32, i32
  }
}

module attributes {stable_mosaic.version = 11 : i64} {
  func.func @_conv_stats_kernel(%arg0: i32, %arg1: memref<1x288x9xf32, #tpu.memory_space<vmem>>, %arg2: memref<3x9x32xf32, #tpu.memory_space<vmem>>, %arg3: memref<1x256x32xf32, #tpu.memory_space<vmem>>, %arg4: memref<1x2x32xf32, #tpu.memory_space<vmem>>) attributes {dimension_semantics = [#tpu.dimension_semantics<parallel>], iteration_bounds = array<i64: 2>, scalar_prefetch = 0 : i64, scratch_operands = 0 : i64, tpu.core_type = #tpu.core_type<tc>, window_params = [{transform_indices = @transform_0, window_bounds = array<i64: 1, 288, 9>}, {pipeline_mode = #tpu.pipeline_mode<synchronous>, transform_indices = @transform_1, window_bounds = array<i64: 3, 9, 32>}, {transform_indices = @transform_2, window_bounds = array<i64: 1, 256, 32>}, {transform_indices = @transform_3, window_bounds = array<i64: 1, 2, 32>}]} {
    %c0 = arith.constant 0 : index
    %c0_0 = arith.constant 0 : index
    %c0_1 = arith.constant 0 : index
    %0 = vector.load %arg1[%c0, %c0_0, %c0_1] : memref<1x288x9xf32, #tpu.memory_space<vmem>>, vector<1x256x9xf32>
    %1 = vector.shape_cast %0 : vector<1x256x9xf32> to vector<256x9xf32>
    %c0_2 = arith.constant 0 : index
    %c0_3 = arith.constant 0 : index
    %c0_4 = arith.constant 0 : index
    %2 = vector.load %arg2[%c0_2, %c0_3, %c0_4] : memref<3x9x32xf32, #tpu.memory_space<vmem>>, vector<1x9x32xf32>
    %3 = vector.shape_cast %2 : vector<1x9x32xf32> to vector<9x32xf32>
    %cst = arith.constant dense<0.000000e+00> : vector<256x32xf32>
    %4 = tpu.matmul %1, %3, %cst {dimension_numbers = #tpu.dot_dimension_numbers<[1], [0], [0], [1], [0, 0, 1, 1], [], []>} : vector<256x9xf32>, vector<9x32xf32>, vector<256x32xf32> -> vector<256x32xf32>
    %c0_5 = arith.constant 0 : index
    %c16 = arith.constant 16 : index
    %c0_6 = arith.constant 0 : index
    %5 = vector.load %arg1[%c0_5, %c16, %c0_6] : memref<1x288x9xf32, #tpu.memory_space<vmem>>, vector<1x256x9xf32>
    %6 = vector.shape_cast %5 : vector<1x256x9xf32> to vector<256x9xf32>
    %c1 = arith.constant 1 : index
    %c0_7 = arith.constant 0 : index
    %c0_8 = arith.constant 0 : index
    %7 = vector.load %arg2[%c1, %c0_7, %c0_8] : memref<3x9x32xf32, #tpu.memory_space<vmem>>, vector<1x9x32xf32>
    %8 = vector.shape_cast %7 : vector<1x9x32xf32> to vector<9x32xf32>
    %cst_9 = arith.constant dense<0.000000e+00> : vector<256x32xf32>
    %9 = tpu.matmul %6, %8, %cst_9 {dimension_numbers = #tpu.dot_dimension_numbers<[1], [0], [0], [1], [0, 0, 1, 1], [], []>} : vector<256x9xf32>, vector<9x32xf32>, vector<256x32xf32> -> vector<256x32xf32>
    %10 = arith.addf %4, %9 : vector<256x32xf32>
    %c0_10 = arith.constant 0 : index
    %c32 = arith.constant 32 : index
    %c0_11 = arith.constant 0 : index
    %11 = vector.load %arg1[%c0_10, %c32, %c0_11] : memref<1x288x9xf32, #tpu.memory_space<vmem>>, vector<1x256x9xf32>
    %12 = vector.shape_cast %11 : vector<1x256x9xf32> to vector<256x9xf32>
    %c2 = arith.constant 2 : index
    %c0_12 = arith.constant 0 : index
    %c0_13 = arith.constant 0 : index
    %13 = vector.load %arg2[%c2, %c0_12, %c0_13] : memref<3x9x32xf32, #tpu.memory_space<vmem>>, vector<1x9x32xf32>
    %14 = vector.shape_cast %13 : vector<1x9x32xf32> to vector<9x32xf32>
    %cst_14 = arith.constant dense<0.000000e+00> : vector<256x32xf32>
    %15 = tpu.matmul %12, %14, %cst_14 {dimension_numbers = #tpu.dot_dimension_numbers<[1], [0], [0], [1], [0, 0, 1, 1], [], []>} : vector<256x9xf32>, vector<9x32xf32>, vector<256x32xf32> -> vector<256x32xf32>
    %16 = arith.addf %10, %15 : vector<256x32xf32>
    %c0_15 = arith.constant 0 : index
    %c0_16 = arith.constant 0 : index
    %c0_17 = arith.constant 0 : index
    %17 = vector.load %arg3[%c0_15, %c0_16, %c0_17] : memref<1x256x32xf32, #tpu.memory_space<vmem>>, vector<1x256x32xf32>
    %18 = vector.shape_cast %17 : vector<1x256x32xf32> to vector<256x32xf32>
    %19 = vector.shape_cast %16 : vector<256x32xf32> to vector<1x256x32xf32>
    tpu.vector_store %arg3[%c0_15, %c0_16, %c0_17], %19 {strides = array<i32>} : memref<1x256x32xf32, #tpu.memory_space<vmem>>, vector<1x256x32xf32>,
    %cst_18 = arith.constant dense<0.000000e+00> : vector<32xf32>
    %20 = vector.multi_reduction <add>, %16, %cst_18 [0] : vector<256x32xf32> to vector<32xf32>
    %21 = vector.shape_cast %20 : vector<32xf32> to vector<1x32xf32>
    %c0_19 = arith.constant 0 : index
    %c0_20 = arith.constant 0 : index
    %c0_21 = arith.constant 0 : index
    %22 = vector.load %arg4[%c0_19, %c0_20, %c0_21] : memref<1x2x32xf32, #tpu.memory_space<vmem>>, vector<1x1x32xf32>
    %23 = vector.shape_cast %22 : vector<1x1x32xf32> to vector<1x32xf32>
    %24 = vector.shape_cast %21 : vector<1x32xf32> to vector<1x1x32xf32>
    tpu.vector_store %arg4[%c0_19, %c0_20, %c0_21], %24 {strides = array<i32>} : memref<1x2x32xf32, #tpu.memory_space<vmem>>, vector<1x1x32xf32>,
    %25 = arith.mulf %16, %16 : vector<256x32xf32>
    %cst_22 = arith.constant dense<0.000000e+00> : vector<32xf32>
    %26 = vector.multi_reduction <add>, %25, %cst_22 [0] : vector<256x32xf32> to vector<32xf32>
    %27 = vector.shape_cast %26 : vector<32xf32> to vector<1x32xf32>
    %c0_23 = arith.constant 0 : index
    %c1_24 = arith.constant 1 : index
    %c0_25 = arith.constant 0 : index
    %28 = vector.load %arg4[%c0_23, %c1_24, %c0_25] : memref<1x2x32xf32, #tpu.memory_space<vmem>>, vector<1x1x32xf32>
    %29 = vector.shape_cast %28 : vector<1x1x32xf32> to vector<1x32xf32>
    %30 = vector.shape_cast %27 : vector<1x32xf32> to vector<1x1x32xf32>
    tpu.vector_store %arg4[%c0_23, %c1_24, %c0_25], %30 {strides = array<i32>} : memref<1x2x32xf32, #tpu.memory_space<vmem>>, vector<1x1x32xf32>,
    return
  }
  func.func @transform_0(%arg0: i32) -> (i32, i32, i32) {
    %c0_i32 = arith.constant 0 : i32
    %c0_i32_0 = arith.constant 0 : i32
    %c0_i32_1 = arith.constant 0 : i32
    return %arg0, %c0_i32, %c0_i32_0 : i32, i32, i32
  }
  func.func @transform_1(%arg0: i32) -> (i32, i32, i32) {
    %c0_i32 = arith.constant 0 : i32
    %c0_i32_0 = arith.constant 0 : i32
    %c0_i32_1 = arith.constant 0 : i32
    %c0_i32_2 = arith.constant 0 : i32
    return %c0_i32, %c0_i32_0, %c0_i32_1 : i32, i32, i32
  }
  func.func @transform_2(%arg0: i32) -> (i32, i32, i32) {
    %c0_i32 = arith.constant 0 : i32
    %c0_i32_0 = arith.constant 0 : i32
    %c0_i32_1 = arith.constant 0 : i32
    return %arg0, %c0_i32, %c0_i32_0 : i32, i32, i32
  }
  func.func @transform_3(%arg0: i32) -> (i32, i32, i32) {
    %c0_i32 = arith.constant 0 : i32
    %c0_i32_0 = arith.constant 0 : i32
    %c0_i32_1 = arith.constant 0 : i32
    return %arg0, %c0_i32, %c0_i32_0 : i32, i32, i32
  }
}

</mosaic_0001>

<bundles_post_ra>
// kernel: squeeze.34
= control target key start
LH: loop header
LB: loop body
LE: loop exit
PB: predicated region body
PF: predicated region fallthrough
CT: control target
= control target key end

     0   :  { %s37_s8 = smov 104   ;;  %vm7_vm0 = vcmask 64512   ;;  %s38_s9 = smov 112   ;;  %s55_s0 = inlined_call_operand.vmem [shape: f32[32], index: 0, kind: input, shape index: {}]   ;;  %s56_s1 = inlined_call_operand.vmem [shape: f32[4,8], index: 1, kind: output, shape index: {}]  }
   0x1   :  { %v4_v0 = vld [vmem:[%s55_s0] sm:$0x1]  ;;  %s36_s0 = smov 120  }
   0x2   :  { %5 = vst [vmem:[#allocation1] sm:$0x1] %v4_v0 }
   0x9   :  { %v9_v1 = vld [vmem:[#allocation1] sm:$0x1]  }
   0xa   :  { %v21_v2 = vld [vmem:[#allocation1] sm:$0x1]   ;;  %10 = vrot.lane.b32.xlu0 %v9_v1, %s36_s0 }
   0xb   :  { %22 = vrot.lane.b32.xlu1 %v21_v2, %s37_s8  ;;  %v6_v3 = vld [vmem:[#allocation1] sm:$0x1]  }
   0xc   :  { %v15_v4 = vld [vmem:[#allocation1] sm:$0x1]   ;;  %8 = vst.msk [vmem:[#allocation0] sm:$0x1] %vm7_vm0, %v6_v3  }
   0xe   :  { %16 = vrot.lane.b32.xlu0 %v15_v4, %s38_s9 }
  0x7c   :  { %v11_v5 = vpop.permute.xlu0 %10  }
  0x7d   :  { %v23_v6 = vpop.permute.xlu1 %22   ;;  %14 = vst.msk [vmem:[#allocation0 + $0x1] sm:$0x1] %vm7_vm0, %v11_v5  }
  0x7e   :  { %26 = vst.msk [vmem:[#allocation0 + $0x3] sm:$0x1] %vm7_vm0, %v23_v6  }
  0x80   :  { %v17_v7 = vpop.permute.xlu0 %16  }
  0x81   :  { %20 = vst.msk [vmem:[#allocation0 + $0x2] sm:$0x1] %vm7_vm0, %v17_v7  }
  0x88   :  { %v30_v8 = vld [vmem:[#allocation0] sm:$0xf] }
  0x89   :  { %32 = vst [vmem:[%s56_s1] sm:$0xf] %v30_v8 }

// kernel: tile.18
= control target key start
LH: loop header
LB: loop body
LE: loop exit
PB: predicated region body
PF: predicated region fallthrough
CT: control target
= control target key end

     0   :  { %s22_s0 = inlined_call_operand.vmem [shape: f32[8], index: 0, kind: input, shape index: {}]   ;;  %s23_s1 = inlined_call_operand.vmem [shape: f32[4,8], index: 1, kind: output, shape index: {}]  }
   0x1   :  { %v4_v0 = vld [vmem:[%s22_s0] ss:$0 sm:$0xff] }
   0x2   :  { %5 = vst [vmem:[%s23_s1] sm:$0xf] %v4_v0 }

// kernel: tile.19
= control target key start
LH: loop header
LB: loop body
LE: loop exit
PB: predicated region body
PF: predicated region fallthrough
CT: control target
= control target key end

     0   :  { %vm7_vm0 = vcmask 64512   ;;  %s37_s8 = smov 8   ;;  %s38_s9 = smov 16   ;;  %vm13_vm1 = vcmask 261312   ;;  %vm19_vm2 = vcmask 195712   ;;  %vm25_vm3 = vcmask 130112   ;;  %s55_s0 = inlined_call_operand.vmem [shape: f32[4,8], index: 0, kind: input, shape index: {}]   ;;  %s56_s1 = inlined_call_operand.vmem [shape: f32[1,32], index: 1, kind: output, shape index: {}]  }
   0x1   :  { %v4_v0 = vld [vmem:[%s55_s0] sm:$0xf]  ;;  %s36_s0 = smov 24  }
   0x2   :  { %5 = vst [vmem:[#allocation1] sm:$0xf] %v4_v0 }
   0x9   :  { %v10_v1 = vld [vmem:[#allocation1 + $0x3] sm:$0x1]   ;;  %v22_v2 = vld [vmem:[#allocation1 + $0x1] sm:$0x1]   ;;  %v6_v3 = vld [vmem:[#allocation1] sm:$0x1]  }
   0xa   :  { %11 = vrot.lane.b32.xlu0 %v10_v1, %s36_s0  ;;  %23 = vrot.lane.b32.xlu1 %v22_v2, %s37_s8  ;;  %v16_v4 = vld [vmem:[#allocation1 + $0x2] sm:$0x1]   ;;  %8 = vst.msk [vmem:[#allocation0] sm:$0x1] %vm7_vm0, %v6_v3  }
   0xe   :  { %17 = vrot.lane.b32.xlu0 %v16_v4, %s38_s9 }
  0x7c   :  { %v12_v5 = vpop.permute.xlu0 %11   ;;  %v24_v6 = vpop.permute.xlu1 %23  }
  0x7d   :  { %14 = vst.msk [vmem:[#allocation0] sm:$0x1] %vm13_vm1, %v12_v5  }
  0x80   :  { %v18_v7 = vpop.permute.xlu0 %17  }
  0x81   :  { %20 = vst.msk [vmem:[#allocation0] sm:$0x1] %vm19_vm2, %v18_v7  }
  0x82   :  { %26 = vst.msk [vmem:[#allocation0] sm:$0x1] %vm25_vm3, %v24_v6  }
  0x89   :  { %v30_v8 = vld [vmem:[#allocation0] sm:$0x1] }
  0x8a   :  { %32 = vst [vmem:[%s56_s1] sm:$0x1] %v30_v8 }

// kernel: g_block_forward.3
= control target key start
LH: loop header
LB: loop body
LE: loop exit
PB: predicated region body
PF: predicated region fallthrough
CT: control target
= control target key end

     0   :  { %s452_s12 = smov 0   ;;  %s674_s0 = inlined_call_operand.vmem [shape: f32[2,256,32], index: 0, kind: input, shape index: {}, may-alias: {0,3}]   ;;  %s675_s1 = inlined_call_operand.vmem [shape: f32[1,32], index: 1, kind: input, shape index: {}]   ;;  %s676_s2 = inlined_call_operand.vmem [shape: f32[1,32], index: 2, kind: input, shape index: {}]   ;;  %s677_s3 = inlined_call_operand.vmem [shape: f32[2,256,32], index: 3, kind: output, shape index: {}, may-alias: {0,3}]  }
   0x1 LB: > { %s401_s13 = sadd.s32 4294967295, %s430_s12   ;;  %p405_p0 = scmp.ge.s32.totalorder %s430_s12, 1  ;;  %s430_s12 = sphi %s452_s12, %s13_s12  }
   0x2   : > { %p137_p1 = scmp.lt.s32.totalorder %s430_s12, 3 }
   0x4   : > { %p138_p2 = pnand %p405_p0, %p137_p1 }
   0x5   : > { %p161_p3 = scmp.lt.s32.totalorder (!%p138_p2), %s401_s13, 1  ;;  %v466_v0 = vld [vmem:[%s675_s1] ss:$0 sm:$0xff] (!%p138_p2)  ;;  %vm313_vm0 = vcmask (!%p138_p2), 261120  }
   0x6   : > { %141 = sbr.rel (%p138_p2) target bundleno = 46 (0x2e), region = 32  ;;  %v478_v1 = vld [vmem:[%s676_s2] ss:$0 sm:$0xff] (!%p138_p2) }
   0xd   : > { %s679_s13 = smov (!%p161_p3, %s401_s13), 1 }
   0xe   : > { %s414_s14 = sshll.u32 %s679_s13, 8 }
   0xf   : > { %s473_s19 = scalar_lea.vmem %s674_s0, %s414_s14  ;;  %s520_s24 = scalar_lea.vmem %s677_s3, %s414_s14 }
  0x10   : > { %v171_v2 = vld [vmem:[%s473_s19] sm:$0xff]  ;;  %v172_v3 = vld [vmem:[%s473_s19 + $0x8] sm:$0xff]  ;;  %v173_v4 = vld [vmem:[%s473_s19 + $0x10] sm:$0xff] }
  0x11   : > { %v174_v5 = vld [vmem:[%s473_s19 + $0x18] sm:$0xff]  ;;  %v175_v6 = vld [vmem:[%s473_s19 + $0x20] sm:$0xff]  ;;  %v176_v7 = vld [vmem:[%s473_s19 + $0x28] sm:$0xff]  ;;  %v210_v8 = vmul.f32 %v466_v0, %v171_v2  ;;  %v211_v9 = vmul.f32 %v466_v0, %v172_v3  ;;  %v212_v10 = vmul.f32 %v466_v0, %v173_v4 }
  0x12   : > { %v177_v11 = vld [vmem:[%s473_s19 + $0x30] sm:$0xff]  ;;  %v178_v12 = vld [vmem:[%s473_s19 + $0x38] sm:$0xff]  ;;  %v213_v13 = vmul.f32 %v466_v0, %v174_v5  ;;  %v214_v14 = vmul.f32 %v466_v0, %v175_v6  ;;  %v215_v15 = vmul.f32 %v466_v0, %v176_v7  ;;  %v179_v20 = vld [vmem:[%s473_s19 + $0x40] sm:$0xff] }
  0x13   : > { %v249_v16 = vadd.f32 %v478_v1, %v210_v8  ;;  %v250_v17 = vadd.f32 %v478_v1, %v211_v9  ;;  %v251_v18 = vadd.f32 %v478_v1, %v212_v10  ;;  %v216_v19 = vmul.f32 %v466_v0, %v177_v11  ;;  %v180_v21 = vld [vmem:[%s473_s19 + $0x48] sm:$0xff]  ;;  %v181_v22 = vld [vmem:[%s473_s19 + $0x50] sm:$0xff]  ;;  %v182_v27 = vld [vmem:[%s473_s19 + $0x58] sm:$0xff] }
  0x14   : > { %v252_v23 = vadd.f32 %v478_v1, %v213_v13  ;;  %v253_v24 = vadd.f32 %v478_v1, %v214_v14  ;;  %v254_v25 = vadd.f32 %v478_v1, %v215_v15  ;;  %v217_v26 = vmul.f32 %v466_v0, %v178_v12  ;;  %v183_v28 = vld [vmem:[%s473_s19 + $0x60] sm:$0xff]  ;;  %v184_v29 = vld [vmem:[%s473_s19 + $0x68] sm:$0xff]  ;;  %v185_v34 = vld [vmem:[%s473_s19 + $0x70] sm:$0xff] }
  0x15   : > { %v281_v30 = vmax.f32 %v249_v16, 0.0  ;;  %v282_v31 = vmax.f32 %v250_v17, 0.0  ;;  %v283_v32 = vmax.f32 %v251_v18, 0.0  ;;  %v255_v33 = vadd.f32 %v478_v1, %v216_v19  ;;  %v186_v39 = vld [vmem:[%s473_s19 + $0x78] sm:$0xff]  ;;  %v187_v44 = vld [vmem:[%s473_s19 + $0x80] sm:$0xff]  ;;  %v188_v45 = vld [vmem:[%s473_s19 + $0x88] sm:$0xff] }
  0x16   : > { %v284_v35 = vmax.f32 %v252_v23, 0.0  ;;  %v285_v36 = vmax.f32 %v253_v24, 0.0  ;;  %v286_v37 = vmax.f32 %v254_v25, 0.0  ;;  %v256_v38 = vadd.f32 %v478_v1, %v217_v26  ;;  %v189_v46 = vld [vmem:[%s473_s19 + $0x90] sm:$0xff]  ;;  %v190_v47 = vld [vmem:[%s473_s19 + $0x98] sm:$0xff]  ;;  %v191_v48 = vld [vmem:[%s473_s19 + $0xa0] sm:$0xff] }
  0x17   : > { %v287_v40 = vmax.f32 %v255_v33, 0.0  ;;  %v218_v41 = vmul.f32 %v466_v0, %v179_v20  ;;  %v219_v42 = vmul.f32 %v466_v0, %v180_v21  ;;  %v220_v43 = vmul.f32 %v466_v0, %v181_v22  ;;  %v192_v49 = vld [vmem:[%s473_s19 + $0xa8] sm:$0xff]  ;;  %v193_v50 = vld [vmem:[%s473_s19 + $0xb0] sm:$0xff]  ;;  %v194_v51 = vld [vmem:[%s473_s19 + $0xb8] sm:$0xff] }
  0x18   : > { %v531_v52 = vld [vmem:[%s473_s19 + $0xc0] sm:$0xff]  ;;  %v534_v53 = vld [vmem:[%s473_s19 + $0xc8] sm:$0xff]  ;;  %v288_v54 = vmax.f32 %v256_v38, 0.0  ;;  %v221_v55 = vmul.f32 %v466_v0, %v182_v27  ;;  %v222_v56 = vmul.f32 %v466_v0, %v183_v28  ;;  %v223_v57 = vmul.f32 %v466_v0, %v184_v29  ;;  %v540_v58 = vld [vmem:[%s473_s19 + $0xd0] sm:$0xff] }
  0x19   : > { %v543_v59 = vld [vmem:[%s473_s19 + $0xd8] sm:$0xff]  ;;  %v546_v60 = vld [vmem:[%s473_s19 + $0xe0] sm:$0xff]  ;;  %v257_v61 = vadd.f32 %v478_v1, %v218_v41  ;;  %v258_v62 = vadd.f32 %v478_v1, %v219_v42  ;;  %v259_v63 = vadd.f32 %v478_v1, %v220_v43  ;;  %v224_v2 = vmul.f32 %v466_v0, %v185_v34  ;;  %v553_v3 = vld [vmem:[%s473_s19 + $0xe8] sm:$0xff] }
  0x1a   : > { %v556_v4 = vld [vmem:[%s473_s19 + $0xf0] sm:$0xff]  ;;  %v559_v5 = vld [vmem:[%s473_s19 + $0xf8] sm:$0xff]  ;;  %v260_v6 = vadd.f32 %v478_v1, %v221_v55  ;;  %v261_v7 = vadd.f32 %v478_v1, %v222_v56  ;;  %v262_v8 = vadd.f32 %v478_v1, %v223_v57  ;;  %v225_v9 = vmul.f32 %v466_v0, %v186_v39 }
  0x1b   : > { %314 = vst.msk [vmem:[%s520_s24] sm:$0xff] %vm313_vm0, %v281_v30  ;;  %315 = vst.msk [vmem:[%s520_s24 + $0x8] sm:$0xff] %vm313_vm0, %v282_v31  ;;  %v289_v10 = vmax.f32 %v257_v61, 0.0  ;;  %v290_v11 = vmax.f32 %v258_v62, 0.0  ;;  %v291_v12 = vmax.f32 %v259_v63, 0.0  ;;  %v263_v13 = vadd.f32 %v478_v1, %v224_v2 }
  0x1c   : > { %316 = vst.msk [vmem:[%s520_s24 + $0x10] sm:$0xff] %vm313_vm0, %v283_v32  ;;  %317 = vst.msk [vmem:[%s520_s24 + $0x18] sm:$0xff] %vm313_vm0, %v284_v35  ;;  %v292_v14 = vmax.f32 %v260_v6, 0.0  ;;  %v293_v15 = vmax.f32 %v261_v7, 0.0  ;;  %v294_v16 = vmax.f32 %v262_v8, 0.0  ;;  %v264_v17 = vadd.f32 %v478_v1, %v225_v9 }
  0x1d   : > { %318 = vst.msk [vmem:[%s520_s24 + $0x20] sm:$0xff] %vm313_vm0, %v285_v36  ;;  %319 = vst.msk [vmem:[%s520_s24 + $0x28] sm:$0xff] %vm313_vm0, %v286_v37  ;;  %v295_v18 = vmax.f32 %v263_v13, 0.0  ;;  %v226_v19 = vmul.f32 %v466_v0, %v187_v44  ;;  %v227_v20 = vmul.f32 %v466_v0, %v188_v45  ;;  %v228_v21 = vmul.f32 %v466_v0, %v189_v46 }
  0x1e   : > { %320 = vst.msk [vmem:[%s520_s24 + $0x30] sm:$0xff] %vm313_vm0, %v287_v40  ;;  %321 = vst.msk [vmem:[%s520_s24 + $0x38] sm:$0xff] %vm313_vm0, %v288_v54  ;;  %v296_v22 = vmax.f32 %v264_v17, 0.0  ;;  %v229_v23 = vmul.f32 %v466_v0, %v190_v47  ;;  %v230_v24 = vmul.f32 %v466_v0, %v191_v48  ;;  %v231_v25 = vmul.f32 %v466_v0, %v192_v49 }
  0x1f   : > { %322 = vst.msk [vmem:[%s520_s24 + $0x40] sm:$0xff] %vm313_vm0, %v289_v10  ;;  %323 = vst.msk [vmem:[%s520_s24 + $0x48] sm:$0xff] %vm313_vm0, %v290_v11  ;;  %v265_v26 = vadd.f32 %v478_v1, %v226_v19  ;;  %v266_v27 = vadd.f32 %v478_v1, %v227_v20  ;;  %v267_v28 = vadd.f32 %v478_v1, %v228_v21 }
  0x20   : > { %324 = vst.msk [vmem:[%s520_s24 + $0x50] sm:$0xff] %vm313_vm0, %v291_v12  ;;  %325 = vst.msk [vmem:[%s520_s24 + $0x58] sm:$0xff] %vm313_vm0, %v292_v14  ;;  %v232_v29 = vmul.f32 %v466_v0, %v193_v50  ;;  %v268_v30 = vadd.f32 %v478_v1, %v229_v23  ;;  %v269_v31 = vadd.f32 %v478_v1, %v230_v24 }
  0x21   : > { %326 = vst.msk [vmem:[%s520_s24 + $0x60] sm:$0xff] %vm313_vm0, %v293_v15  ;;  %327 = vst.msk [vmem:[%s520_s24 + $0x68] sm:$0xff] %vm313_vm0, %v294_v16  ;;  %v270_v32 = vadd.f32 %v478_v1, %v231_v25  ;;  %v233_v33 = vmul.f32 %v466_v0, %v194_v51  ;;  %v297_v34 = vmax.f32 %v265_v26, 0.0  ;;  %v298_v35 = vmax.f32 %v266_v27, 0.0 }
  0x22   : > { %328 = vst.msk [vmem:[%s520_s24 + $0x70] sm:$0xff] %vm313_vm0, %v295_v18  ;;  %329 = vst.msk [vmem:[%s520_s24 + $0x78] sm:$0xff] %vm313_vm0, %v296_v22  ;;  %v299_v36 = vmax.f32 %v267_v28, 0.0  ;;  %v271_v37 = vadd.f32 %v478_v1, %v232_v29  ;;  %v300_v38 = vmax.f32 %v268_v30, 0.0  ;;  %v301_v39 = vmax.f32 %v269_v31, 0.0 }
  0x23   : > { %v302_v40 = vmax.f32 %v270_v32, 0.0  ;;  %v272_v41 = vadd.f32 %v478_v1, %v233_v33  ;;  %330 = vst.msk [vmem:[%s520_s24 + $0x80] sm:$0xff] %vm313_vm0, %v297_v34  ;;  %331 = vst.msk [vmem:[%s520_s24 + $0x88] sm:$0xff] %vm313_vm0, %v298_v35  ;;  %v234_v43 = vmul.f32 %v466_v0, %v531_v52  ;;  %v235_v44 = vmul.f32 %v466_v0, %v534_v53 }
  0x24   : > { %332 = vst.msk [vmem:[%s520_s24 + $0x90] sm:$0xff] %vm313_vm0, %v299_v36  ;;  %v303_v42 = vmax.f32 %v271_v37, 0.0  ;;  %v236_v45 = vmul.f32 %v466_v0, %v540_v58  ;;  %333 = vst.msk [vmem:[%s520_s24 + $0x98] sm:$0xff] %vm313_vm0, %v300_v38  ;;  %v237_v47 = vmul.f32 %v466_v0, %v543_v59  ;;  %v238_v48 = vmul.f32 %v466_v0, %v546_v60 }
  0x25   : > { %334 = vst.msk [vmem:[%s520_s24 + $0xa0] sm:$0xff] %vm313_vm0, %v301_v39  ;;  %335 = vst.msk [vmem:[%s520_s24 + $0xa8] sm:$0xff] %vm313_vm0, %v302_v40  ;;  %v304_v46 = vmax.f32 %v272_v41, 0.0  ;;  %v239_v49 = vmul.f32 %v466_v0, %v553_v3  ;;  %v273_v50 = vadd.f32 %v478_v1, %v234_v43  ;;  %v274_v51 = vadd.f32 %v478_v1, %v235_v44 }
  0x26   : > { %336 = vst.msk [vmem:[%s520_s24 + $0xb0] sm:$0xff] %vm313_vm0, %v303_v42  ;;  %v275_v52 = vadd.f32 %v478_v1, %v236_v45  ;;  %v240_v53 = vmul.f32 %v466_v0, %v556_v4  ;;  %v276_v54 = vadd.f32 %v478_v1, %v237_v47  ;;  %v277_v55 = vadd.f32 %v478_v1, %v238_v48 }
  0x27   : > { %337 = vst.msk [vmem:[%s520_s24 + $0xb8] sm:$0xff] %vm313_vm0, %v304_v46  ;;  %v278_v56 = vadd.f32 %v478_v1, %v239_v49  ;;  %v241_v57 = vmul.f32 %v466_v0, %v559_v5  ;;  %v305_v58 = vmax.f32 %v273_v50, 0.0  ;;  %v306_v59 = vmax.f32 %v274_v51, 0.0 }
  0x28   : > { %v307_v60 = vmax.f32 %v275_v52, 0.0  ;;  %v279_v61 = vadd.f32 %v478_v1, %v240_v53  ;;  %v308_v62 = vmax.f32 %v276_v54, 0.0  ;;  %v309_v63 = vmax.f32 %v277_v55, 0.0 }
  0x29   : > { %v310_v2 = vmax.f32 %v278_v56, 0.0  ;;  %v280_v3 = vadd.f32 %v478_v1, %v241_v57  ;;  %338 = vst.msk [vmem:[%s520_s24 + $0xc0] sm:$0xff] %vm313_vm0, %v305_v58  ;;  %339 = vst.msk [vmem:[%s520_s24 + $0xc8] sm:$0xff] %vm313_vm0, %v306_v59 }
  0x2a   : > { %340 = vst.msk [vmem:[%s520_s24 + $0xd0] sm:$0xff] %vm313_vm0, %v307_v60  ;;  %v311_v4 = vmax.f32 %v279_v61, 0.0  ;;  %341 = vst.msk [vmem:[%s520_s24 + $0xd8] sm:$0xff] %vm313_vm0, %v308_v62 }
  0x2b   : > { %342 = vst.msk [vmem:[%s520_s24 + $0xe0] sm:$0xff] %vm313_vm0, %v309_v63  ;;  %343 = vst.msk [vmem:[%s520_s24 + $0xe8] sm:$0xff] %vm313_vm0, %v310_v2  ;;  %v312_v0 = vmax.f32 %v280_v3, 0.0 }
  0x2c   : > { %344 = vst.msk [vmem:[%s520_s24 + $0xf0] sm:$0xff] %vm313_vm0, %v311_v4 }
  0x2d   : > { %345 = vst.msk [vmem:[%s520_s24 + $0xf8] sm:$0xff] %vm313_vm0, %v312_v0 }
  0x2e PF: > { %s13_s12 = sadd.s32 1, %s430_s12  }
  0x2f   : > { %p10_p4 = scmp.ge.s32.totalorder %s13_s12, 4  }
  0x31   :  { %12 = sbr.rel (!%p10_p4) target bundleno = 1 (0x1), region = 62 }

// kernel: g_block_forward.2
= control target key start
LH: loop header
LB: loop body
LE: loop exit
PB: predicated region body
PF: predicated region fallthrough
CT: control target
= control target key end

     0   :  { %s1960_s12 = smov 0   ;;  %s2311_s0 = inlined_call_operand.vmem [shape: f32[2,288,9], index: 0, kind: input, shape index: {}]   ;;  %s2312_s1 = inlined_call_operand.vmem [shape: f32[3,9,32], index: 1, kind: input, shape index: {}]   ;;  %s2313_s2 = inlined_call_operand.vmem [shape: f32[2,256,32], index: 2, kind: output, shape index: {0}]   ;;  %s2314_s3 = inlined_call_operand.vmem [shape: f32[2,2,32], index: 3, kind: output, shape index: {1}]  }
   0x1 LB: > { %s1464_s13 = sadd.s32 4294967295, %s1937_s12   ;;  %p1468_p0 = scmp.ge.s32.totalorder %s1937_s12, 1  ;;  %s1937_s12 = sphi %s1960_s12, %s14_s12  }
   0x2   : > { %p140_p1 = scmp.lt.s32.totalorder %s1937_s12, 3 }
   0x4   : > { %p141_p2 = pnand %p1468_p0, %p140_p1 }
   0x5   : > { %v1473_v0 = vld [vmem:[%s2312_s1 + $0x10] sm:$0xff] (!%p141_p2)  ;;  %v1474_v1 = vld [vmem:[%s2312_s1 + $0x18] sm:$0x1] (!%p141_p2)  ;;  %vm318_vm0 = vcmask (!%p141_p2), 1040384   ;;  %v214_v2 = vld [vmem:[%s2312_s1] sm:$0xff] (!%p141_p2)  ;;  %vm1939_vm1 = vmmov (!%p141_p2), 1  }
   0x6   : > { %144 = sbr.rel (%p141_p2) target bundleno = 346 (0x15a), region = 28  ;;  %v1837_v3 = vpack.c.bf16 (!%p141_p2), %v1474_v1, %v1473_v0  ;;  %vm1977_vm2 = vmpackc.low (!%p141_p2), %vm318_vm0, %vm1939_vm1  ;;  %v215_v5 = vld [vmem:[%s2312_s1 + $0x8] sm:$0x1] (!%p141_p2)  ;;  %p168_p3 = scmp.lt.s32.totalorder (!%p141_p2), %s1464_s13, 1  ;;  %v1541_v6 = vld [vmem:[%s2312_s1 + $0x20] sm:$0xff] (!%p141_p2)  ;;  %vm221_vm3 = vcmask (!%p141_p2), 72704  }
   0x7   : > { %v1843_v7 = vpack.c.bf16 (!%p141_p2), %v215_v5, %v214_v2  ;;  %v1542_v8 = vld [vmem:[%s2312_s1 + $0x28] sm:$0x1] (!%p141_p2)  ;;  %vm1172_vm4 = vcmask (!%p141_p2), 261120   ;;  %vm1274_vm5 = vcmask (!%p141_p2), 253952  }
   0x8   : > { %1839 = vmatprep.subr.msk.bf16.mxu1 (!%p141_p2), %vm1977_vm2, %v1837_v3  ;;  %v1849_v9 = vpack.c.bf16 (!%p141_p2), %v1542_v8, %v1541_v6 }
   0x9   : > { %1845 = vmatprep.subr.msk.bf16.mxu0 (!%p141_p2), %vm1977_vm2, %v1843_v7  ;;  %1842 = vmatpush3.bf16.msk.msra.mxu1 (!%p141_p2), %vm1977_vm2, %v1837_v3 }
   0xa   : > { %1848 = vmatpush3.bf16.msk.msra.mxu0 (!%p141_p2), %vm1977_vm2, %v1843_v7  ;;  %1855 = vmatprep.subr.msk.bf16.mxu1 (!%p141_p2), %vm1977_vm2, %v1843_v7 }
   0xb   : > { %1851 = vmatprep.subr.msk.bf16.mxu0 (!%p141_p2), %vm1977_vm2, %v1849_v9 }
   0xd   : > { %s2318_s13 = smov (!%p168_p3, %s1464_s13), 1 }
   0xe   : > { %s1921_s26 = smul.u32 288, %s2318_s13  ;;  %s1578_s30 = sshll.u32 %s2318_s13, 8 }
   0xf   : > { %s2166_s6 = scalar_lea.vmem %s2313_s2, %s1578_s30  ;;  %s1472_s7 = sshll.u32 %s2318_s13, 1 }
  0x10   : > { %s2008_s29 = scalar_lea.vmem %s2311_s0, %s1921_s26  ;;  %s181_s10 = scalar_lea.vmem %s2314_s3, %s1472_s7 }
  0x11   : > { %v184_v10 = vld [vmem:[%s2008_s29 + $0x10] sm:$0xff]  ;;  %v182_v11 = vld [vmem:[%s2008_s29] sm:$0xff]  ;;  %v185_v12 = vld [vmem:[%s2008_s29 + $0x18] sm:$0xff] }
  0x12   : > { %1685 = vmatprep.mubr.msk.f32.mxu1 %vm221_vm3, %v184_v10  ;;  %1737 = vmatprep.mubr.msk.f32.mxu0 %vm221_vm3, %v182_v11  ;;  %v183_v13 = vld [vmem:[%s2008_s29 + $0x8] sm:$0xff]  ;;  %v186_v14 = vld [vmem:[%s2008_s29 + $0x20] sm:$0xff]  ;;  %v188_v16 = vld [vmem:[%s2008_s29 + $0x30] sm:$0xff] }
  0x13   : > { %1686 = vmatmul.mubr.msk.f32.vlgmr.msra.gmra.mrb[0].mxu1 %vm221_vm3, %v185_v12  ;;  %1738 = vmatmul.mubr.msk.f32.vlgmr.msra.gmra.mrb[0].mxu0 %vm221_vm3, %v183_v13  ;;  %v187_v15 = vld [vmem:[%s2008_s29 + $0x28] sm:$0xff]  ;;  %v189_v17 = vld [vmem:[%s2008_s29 + $0x38] sm:$0xff]  ;;  %v190_v18 = vld [vmem:[%s2008_s29 + $0x40] sm:$0xff] }
  0x14   : > { %1856 = vmatpush3.bf16.msk.msra.mxu1 %vm1977_vm2, %v1843_v7  ;;  %1854 = vmatpush3.bf16.msk.msra.mxu0 %vm1977_vm2, %v1849_v9  ;;  %v191_v19 = vld [vmem:[%s2008_s29 + $0x48] sm:$0xff]  ;;  %v192_v20 = vld [vmem:[%s2008_s29 + $0x50] sm:$0xff]  ;;  %v193_v21 = vld [vmem:[%s2008_s29 + $0x58] sm:$0xff] }
  0x15   : > { %1688 = vmatprep.mubr.msk.f32.mxu1 %vm221_vm3, %v186_v14  ;;  %1740 = vmatprep.mubr.msk.f32.mxu0 %vm221_vm3, %v184_v10  ;;  %v194_v22 = vld [vmem:[%s2008_s29 + $0x60] sm:$0xff]  ;;  %v195_v23 = vld [vmem:[%s2008_s29 + $0x68] sm:$0xff]  ;;  %v196_v24 = vld [vmem:[%s2008_s29 + $0x70] sm:$0xff] }
  0x16   : > { %v197_v25 = vld [vmem:[%s2008_s29 + $0x78] sm:$0xff]  ;;  %v198_v26 = vld [vmem:[%s2008_s29 + $0x80] sm:$0xff]  ;;  %v199_v27 = vld [vmem:[%s2008_s29 + $0x88] sm:$0xff] }
  0x17   : > { %1689 = vmatmul.mubr.msk.f32.gmra.mrb[2].mxu1 %vm221_vm3, %v187_v15  ;;  %1741 = vmatmul.mubr.msk.f32.gmra.mrb[2].mxu0 %vm221_vm3, %v185_v12  ;;  %v200_v28 = vld [vmem:[%s2008_s29 + $0x90] sm:$0xff]  ;;  %v201_v29 = vld [vmem:[%s2008_s29 + $0x98] sm:$0xff]  ;;  %v202_v30 = vld [vmem:[%s2008_s29 + $0xa0] sm:$0xff] }
  0x18   : > { %1691 = vmatprep.mubr.msk.f32.mxu1 %vm221_vm3, %v188_v16  ;;  %1743 = vmatprep.mubr.msk.f32.mxu0 %vm221_vm3, %v186_v14  ;;  %v203_v31 = vld [vmem:[%s2008_s29 + $0xa8] sm:$0xff]  ;;  %v204_v32 = vld [vmem:[%s2008_s29 + $0xb0] sm:$0xff]  ;;  %v205_v33 = vld [vmem:[%s2008_s29 + $0xb8] sm:$0xff] }
  0x19   : > { %v206_v34 = vld [vmem:[%s2008_s29 + $0xc0] sm:$0xff]  ;;  %v207_v35 = vld [vmem:[%s2008_s29 + $0xc8] sm:$0xff]  ;;  %v208_v36 = vld [vmem:[%s2008_s29 + $0xd0] sm:$0xff] }
  0x1a   : > { %v209_v37 = vld [vmem:[%s2008_s29 + $0xd8] sm:$0xff]  ;;  %v210_v38 = vld [vmem:[%s2008_s29 + $0xe0] sm:$0xff]  ;;  %v211_v39 = vld [vmem:[%s2008_s29 + $0xe8] sm:$0xff] }
  0x1b   : > { %1692 = vmatmul.mubr.msk.f32.gmra.mrb[4].mxu1 %vm221_vm3, %v189_v17  ;;  %1744 = vmatmul.mubr.msk.f32.gmra.mrb[4].mxu0 %vm221_vm3, %v187_v15  ;;  %v212_v40 = vld [vmem:[%s2008_s29 + $0xf0] sm:$0xff]  ;;  %v213_v41 = vld [vmem:[%s2008_s29 + $0xf8] sm:$0xff]  ;;  %v216_v42 = vld [vmem:[%s2008_s29 + $0x100] sm:$0xff] }
  0x1c   : > { %1694 = vmatprep.mubr.msk.f32.mxu1 %vm221_vm3, %v190_v18  ;;  %1746 = vmatprep.mubr.msk.f32.mxu0 %vm221_vm3, %v188_v16  ;;  %v217_v43 = vld [vmem:[%s2008_s29 + $0x108] sm:$0xff]  ;;  %v811_v44 = vld [vmem:[%s2008_s29 + $0x110] sm:$0xff]  ;;  %v812_v45 = vld [vmem:[%s2008_s29 + $0x118] sm:$0xff] }
  0x1f   : > { %1695 = vmatmul.mubr.msk.f32.gmra.mrb[6].mxu1 %vm221_vm3, %v191_v19  ;;  %1747 = vmatmul.mubr.msk.f32.gmra.mrb[6].mxu0 %vm221_vm3, %v189_v17 }
  0x20   : > { %1697 = vmatprep.mubr.msk.f32.mxu1 %vm221_vm3, %v192_v20  ;;  %1749 = vmatprep.mubr.msk.f32.mxu0 %vm221_vm3, %v190_v18 }
  0x23   : > { %1698 = vmatmul.mubr.msk.f32.gmra.mrb[8].mxu1 %vm221_vm3, %v193_v21  ;;  %1750 = vmatmul.mubr.msk.f32.gmra.mrb[8].mxu0 %vm221_vm3, %v191_v19 }
  0x24   : > { %1700 = vmatprep.mubr.msk.f32.mxu1 %vm221_vm3, %v194_v22  ;;  %1752 = vmatprep.mubr.msk.f32.mxu0 %vm221_vm3, %v192_v20 }
  0x27   : > { %1701 = vmatmul.mubr.msk.f32.gmra.mrb[10].mxu1 %vm221_vm3, %v195_v23  ;;  %1753 = vmatmul.mubr.msk.f32.gmra.mrb[10].mxu0 %vm221_vm3, %v193_v21 }
  0x28   : > { %1703 = vmatprep.mubr.msk.f32.mxu1 %vm221_vm3, %v196_v24  ;;  %1755 = vmatprep.mubr.msk.f32.mxu0 %vm221_vm3, %v194_v22 }
  0x2b   : > { %1704 = vmatmul.mubr.msk.f32.gmra.mrb[12].mxu1 %vm221_vm3, %v197_v25  ;;  %1756 = vmatmul.mubr.msk.f32.gmra.mrb[12].mxu0 %vm221_vm3, %v195_v23 }
  0x2c   : > { %1706 = vmatprep.mubr.msk.f32.mxu1 %vm221_vm3, %v198_v26  ;;  %1758 = vmatprep.mubr.msk.f32.mxu0 %vm221_vm3, %v196_v24 }
  0x2f   : > { %1707 = vmatmul.mubr.msk.f32.gmra.mrb[14].mxu1 %vm221_vm3, %v199_v27  ;;  %1759 = vmatmul.mubr.msk.f32.gmra.mrb[14].mxu0 %vm221_vm3, %v197_v25 }
  0x30   : > { %1709 = vmatprep.mubr.msk.f32.mxu1 %vm221_vm3, %v200_v28  ;;  %1789 = vmatprep.mubr.msk.f32.mxu0 %vm221_vm3, %v186_v14 }
  0x33   : > { %1710 = vmatmul.mubr.msk.f32.gmra.mrb[16].mxu1 %vm221_vm3, %v201_v29  ;;  %1790 = vmatmul.mubr.msk.f32.vlgmr.msra.gmra.mrb[0].mxu0 %vm221_vm3, %v187_v15 }
  0x34   : > { %1712 = vmatprep.mubr.msk.f32.mxu1 %vm221_vm3, %v202_v30  ;;  %1792 = vmatprep.mubr.msk.f32.mxu0 %vm221_vm3, %v188_v16 }
  0x37   : > { %1713 = vmatmul.mubr.msk.f32.gmra.mrb[18].mxu1 %vm221_vm3, %v203_v31  ;;  %1793 = vmatmul.mubr.msk.f32.gmra.mrb[2].mxu0 %vm221_vm3, %v189_v17 }
  0x38   : > { %1715 = vmatprep.mubr.msk.f32.mxu1 %vm221_vm3, %v204_v32  ;;  %1795 = vmatprep.mubr.msk.f32.mxu0 %vm221_vm3, %v190_v18 }
  0x3b   : > { %1716 = vmatmul.mubr.msk.f32.gmra.mrb[20].mxu1 %vm221_vm3, %v205_v33  ;;  %1796 = vmatmul.mubr.msk.f32.gmra.mrb[4].mxu0 %vm221_vm3, %v191_v19 }
  0x3c   : > { %1718 = vmatprep.mubr.msk.f32.mxu1 %vm221_vm3, %v206_v34  ;;  %1798 = vmatprep.mubr.msk.f32.mxu0 %vm221_vm3, %v192_v20 }
  0x3f   : > { %1719 = vmatmul.mubr.msk.f32.gmra.mrb[22].mxu1 %vm221_vm3, %v207_v35  ;;  %1799 = vmatmul.mubr.msk.f32.gmra.mrb[6].mxu0 %vm221_vm3, %v193_v21 }
  0x40   : > { %1721 = vmatprep.mubr.msk.f32.mxu1 %vm221_vm3, %v208_v36  ;;  %1801 = vmatprep.mubr.msk.f32.mxu0 %vm221_vm3, %v194_v22 }
  0x43   : > { %1722 = vmatmul.mubr.msk.f32.gmra.mrb[24].mxu1 %vm221_vm3, %v209_v37  ;;  %1802 = vmatmul.mubr.msk.f32.gmra.mrb[8].mxu0 %vm221_vm3, %v195_v23 }
  0x44   : > { %1724 = vmatprep.mubr.msk.f32.mxu1 %vm221_vm3, %v210_v38  ;;  %1804 = vmatprep.mubr.msk.f32.mxu0 %vm221_vm3, %v196_v24 }
  0x47   : > { %1725 = vmatmul.mubr.msk.f32.gmra.mrb[26].mxu1 %vm221_vm3, %v211_v39  ;;  %1805 = vmatmul.mubr.msk.f32.gmra.mrb[10].mxu0 %vm221_vm3, %v197_v25 }
  0x48   : > { %1727 = vmatprep.mubr.msk.f32.mxu1 %vm221_vm3, %v212_v40  ;;  %1807 = vmatprep.mubr.msk.f32.mxu0 %vm221_vm3, %v198_v26 }
  0x4b   : > { %1728 = vmatmul.mubr.msk.f32.gmra.mrb[28].mxu1 %vm221_vm3, %v213_v41  ;;  %1808 = vmatmul.mubr.msk.f32.gmra.mrb[12].mxu0 %vm221_vm3, %v199_v27 }
  0x4c   : > { %1730 = vmatprep.mubr.msk.f32.mxu1 %vm221_vm3, %v216_v42  ;;  %1810 = vmatprep.mubr.msk.f32.mxu0 %vm221_vm3, %v200_v28 }
  0x4f   : > { %1731 = vmatmul.mubr.msk.f32.gmra.mrb[30].mxu1 %vm221_vm3, %v217_v43  ;;  %1811 = vmatmul.mubr.msk.f32.gmra.mrb[14].mxu0 %vm221_vm3, %v201_v29 }
  0x50   : > { %1761 = vmatprep.mubr.msk.f32.mxu1 %vm221_vm3, %v198_v26  ;;  %1813 = vmatprep.mubr.msk.f32.mxu0 %vm221_vm3, %v202_v30 }
  0x53   : > { %1762 = vmatmul.mubr.msk.f32.vlgmr.msra.gmra.mrb[16].mxu1 %vm221_vm3, %v199_v27  ;;  %1814 = vmatmul.mubr.msk.f32.gmra.mrb[16].mxu0 %vm221_vm3, %v203_v31 }
  0x54   : > { %1764 = vmatprep.mubr.msk.f32.mxu1 %vm221_vm3, %v200_v28  ;;  %1816 = vmatprep.mubr.msk.f32.mxu0 %vm221_vm3, %v204_v32 }
  0x57   : > { %1765 = vmatmul.mubr.msk.f32.gmra.mrb[18].mxu1 %vm221_vm3, %v201_v29  ;;  %1817 = vmatmul.mubr.msk.f32.gmra.mrb[18].mxu0 %vm221_vm3, %v205_v33 }
  0x58   : > { %1767 = vmatprep.mubr.msk.f32.mxu1 %vm221_vm3, %v202_v30  ;;  %1819 = vmatprep.mubr.msk.f32.mxu0 %vm221_vm3, %v206_v34 }
  0x5b   : > { %1768 = vmatmul.mubr.msk.f32.gmra.mrb[20].mxu1 %vm221_vm3, %v203_v31  ;;  %1820 = vmatmul.mubr.msk.f32.gmra.mrb[20].mxu0 %vm221_vm3, %v207_v35 }
  0x5c   : > { %1770 = vmatprep.mubr.msk.f32.mxu1 %vm221_vm3, %v204_v32  ;;  %1822 = vmatprep.mubr.msk.f32.mxu0 %vm221_vm3, %v208_v36 }
  0x5f   : > { %1771 = vmatmul.mubr.msk.f32.gmra.mrb[22].mxu1 %vm221_vm3, %v205_v33  ;;  %1823 = vmatmul.mubr.msk.f32.gmra.mrb[22].mxu0 %vm221_vm3, %v209_v37 }
  0x60   : > { %1773 = vmatprep.mubr.msk.f32.mxu1 %vm221_vm3, %v206_v34  ;;  %1825 = vmatprep.mubr.msk.f32.mxu0 %vm221_vm3, %v210_v38 }
  0x63   : > { %1774 = vmatmul.mubr.msk.f32.gmra.mrb[24].mxu1 %vm221_vm3, %v207_v35  ;;  %1826 = vmatmul.mubr.msk.f32.gmra.mrb[24].mxu0 %vm221_vm3, %v211_v39 }
  0x64   : > { %1776 = vmatprep.mubr.msk.f32.mxu1 %vm221_vm3, %v208_v36  ;;  %1828 = vmatprep.mubr.msk.f32.mxu0 %vm221_vm3, %v212_v40 }
  0x67   : > { %1777 = vmatmul.mubr.msk.f32.gmra.mrb[26].mxu1 %vm221_vm3, %v209_v37  ;;  %1829 = vmatmul.mubr.msk.f32.gmra.mrb[26].mxu0 %vm221_vm3, %v213_v41 }
  0x68   : > { %1779 = vmatprep.mubr.msk.f32.mxu1 %vm221_vm3, %v210_v38  ;;  %1831 = vmatprep.mubr.msk.f32.mxu0 %vm221_vm3, %v216_v42 }
  0x6b   : > { %1780 = vmatmul.mubr.msk.f32.gmra.mrb[28].mxu1 %vm221_vm3, %v211_v39  ;;  %1832 = vmatmul.mubr.msk.f32.gmra.mrb[28].mxu0 %vm221_vm3, %v217_v43 }
  0x6c   : > { %1782 = vmatprep.mubr.msk.f32.mxu1 %vm221_vm3, %v212_v40  ;;  %1834 = vmatprep.mubr.msk.f32.mxu0 %vm221_vm3, %v811_v44 }
  0x6f   : > { %1783 = vmatmul.mubr.msk.f32.gmra.mrb[30].mxu1 %vm221_vm3, %v213_v41  ;;  %1835 = vmatmul.mubr.msk.f32.gmra.mrb[30].mxu0 %vm221_vm3, %v812_v45 }
  0xe6   : > { %v1687_v46 = vpop.f32.mrb[0].mxu1 }
  0xe7   : > { %v388_v47 = vpop.f32.mrb[1].mxu1 }
  0xea   : > { %v1690_v48 = vpop.f32.mrb[2].mxu1 }
  0xeb   : > { %v398_v49 = vpop.f32.mrb[3].mxu1 }
  0xee   : > { %v1693_v50 = vpop.f32.mrb[4].mxu1 }
  0xef   : > { %v408_v51 = vpop.f32.mrb[5].mxu1 }
  0xf2   : > { %v1696_v52 = vpop.f32.mrb[6].mxu1 }
  0xf3   : > { %v418_v53 = vpop.f32.mrb[7].mxu1 }
  0xf6   : > { %v2146_v54 = vpop.f32.mrb[8].mxu1 }
  0xf7   : > { %v2148_v55 = vpop.f32.mrb[9].mxu1 }
  0xfa   : > { %v2150_v56 = vpop.f32.mrb[10].mxu1 }
  0xfb   : > { %v2152_v57 = vpop.f32.mrb[11].mxu1 }
  0xfe   : > { %v2154_v58 = vpop.f32.mrb[12].mxu1 }
  0xff   : > { %v2156_v59 = vpop.f32.mrb[13].mxu1 }
 0x102   : > { %v2158_v60 = vpop.f32.mrb[14].mxu1 }
 0x103   : > { %v2160_v61 = vpop.f32.mrb[15].mxu1 }
 0x106   : > { %v1791_v62 = vpop.f32.mrb[0].mxu0 }
 0x107   : > { %v1857_v63 = vadd.f32 %v1791_v62, %v1687_v46  ;;  %v981_v0 = vpop.f32.mrb[1].mxu0 }
 0x108   : > { %v1858_v1 = vadd.f32 %v981_v0, %v388_v47 }
 0x109   : > { %1174 = vst.msk [vmem:[%s2166_s6 + $0x8] sm:$0xff] %vm1172_vm4, %v1857_v63  ;;  %v1206_v2 = vsel %vm1172_vm4, %v1857_v63, 0.0  ;;  %v1277_v3 = vmul.f32 %v1857_v63, %v1857_v63 }
 0x10a   : > { %1173 = vst.msk [vmem:[%s2166_s6] sm:$0xff] %vm1172_vm4, %v1858_v1  ;;  %v1205_v4 = vsel %vm1172_vm4, %v1858_v1, 0.0  ;;  %v1276_v5 = vmul.f32 %v1858_v1, %v1858_v1  ;;  %v1794_v6 = vpop.f32.mrb[2].mxu0 }
 0x10b   : > { %v1309_v7 = vsel %vm1172_vm4, %v1277_v3, 0.0  ;;  %v1207_v8 = vadd.f32 %v1206_v2, %v1205_v4  ;;  %v1859_v9 = vadd.f32 %v1794_v6, %v1690_v48  ;;  %v991_v10 = vpop.f32.mrb[3].mxu0 }
 0x10c   : > { %v1308_v11 = vsel %vm1172_vm4, %v1276_v5, 0.0  ;;  %v1860_v12 = vadd.f32 %v991_v10, %v398_v49 }
 0x10d   : > { %v1310_v13 = vadd.f32 %v1309_v7, %v1308_v11  ;;  %1176 = vst.msk [vmem:[%s2166_s6 + $0x18] sm:$0xff] %vm1172_vm4, %v1859_v9  ;;  %v1279_v14 = vmul.f32 %v1859_v9, %v1859_v9  ;;  %v1210_v21 = vsel %vm1172_vm4, %v1859_v9, 0.0 }
 0x10e   : > { %1175 = vst.msk [vmem:[%s2166_s6 + $0x10] sm:$0xff] %vm1172_vm4, %v1860_v12  ;;  %v1208_v15 = vsel %vm1172_vm4, %v1860_v12, 0.0  ;;  %v1278_v16 = vmul.f32 %v1860_v12, %v1860_v12  ;;  %v1797_v17 = vpop.f32.mrb[4].mxu0 }
 0x10f   : > { %v1209_v18 = vadd.f32 %v1208_v15, %v1207_v8  ;;  %v1861_v19 = vadd.f32 %v1797_v17, %v1693_v50  ;;  %v1001_v20 = vpop.f32.mrb[5].mxu0  ;;  %v1313_v26 = vsel %vm1172_vm4, %v1279_v14, 0.0 }
 0x110   : > { %v1311_v22 = vsel %vm1172_vm4, %v1278_v16, 0.0  ;;  %v1862_v23 = vadd.f32 %v1001_v20, %v408_v51 }
 0x111   : > { %v1312_v24 = vadd.f32 %v1311_v22, %v1310_v13  ;;  %1178 = vst.msk [vmem:[%s2166_s6 + $0x28] sm:$0xff] %vm1172_vm4, %v1861_v19  ;;  %v1211_v25 = vadd.f32 %v1210_v21, %v1209_v18  ;;  %v1281_v27 = vmul.f32 %v1861_v19, %v1861_v19  ;;  %v1214_v35 = vsel %vm1172_vm4, %v1861_v19, 0.0 }
 0x112   : > { %1177 = vst.msk [vmem:[%s2166_s6 + $0x20] sm:$0xff] %vm1172_vm4, %v1862_v23  ;;  %v1212_v28 = vsel %vm1172_vm4, %v1862_v23, 0.0  ;;  %v1280_v29 = vmul.f32 %v1862_v23, %v1862_v23  ;;  %v1800_v30 = vpop.f32.mrb[6].mxu0 }
 0x113   : > { %v1213_v31 = vadd.f32 %v1212_v28, %v1211_v25  ;;  %v1314_v32 = vadd.f32 %v1313_v26, %v1312_v24  ;;  %v1863_v33 = vadd.f32 %v1800_v30, %v1696_v52  ;;  %v1011_v34 = vpop.f32.mrb[7].mxu0  ;;  %v1317_v40 = vsel %vm1172_vm4, %v1281_v27, 0.0 }
 0x114   : > { %v1315_v36 = vsel %vm1172_vm4, %v1280_v29, 0.0  ;;  %v1864_v37 = vadd.f32 %v1011_v34, %v418_v53 }
 0x115   : > { %v1316_v38 = vadd.f32 %v1315_v36, %v1314_v32  ;;  %1180 = vst.msk [vmem:[%s2166_s6 + $0x38] sm:$0xff] %vm1172_vm4, %v1863_v33  ;;  %v1215_v39 = vadd.f32 %v1214_v35, %v1213_v31  ;;  %v1283_v41 = vmul.f32 %v1863_v33, %v1863_v33  ;;  %v1218_v49 = vsel %vm1172_vm4, %v1863_v33, 0.0 }
 0x116   : > { %1179 = vst.msk [vmem:[%s2166_s6 + $0x30] sm:$0xff] %vm1172_vm4, %v1864_v37  ;;  %v1216_v42 = vsel %vm1172_vm4, %v1864_v37, 0.0  ;;  %v1282_v43 = vmul.f32 %v1864_v37, %v1864_v37  ;;  %v1803_v44 = vpop.f32.mrb[8].mxu0 }
 0x117   : > { %v1217_v45 = vadd.f32 %v1216_v42, %v1215_v39  ;;  %v1318_v46 = vadd.f32 %v1317_v40, %v1316_v38  ;;  %v1865_v47 = vadd.f32 %v1803_v44, %v2146_v54  ;;  %v1021_v48 = vpop.f32.mrb[9].mxu0  ;;  %v1321_v62 = vsel %vm1172_vm4, %v1283_v41, 0.0 }
 0x118   : > { %v1319_v50 = vsel %vm1172_vm4, %v1282_v43, 0.0  ;;  %v1866_v51 = vadd.f32 %v1021_v48, %v2148_v55 }
 0x119   : > { %v1320_v52 = vadd.f32 %v1319_v50, %v1318_v46  ;;  %1182 = vst.msk [vmem:[%s2166_s6 + $0x48] sm:$0xff] %vm1172_vm4, %v1865_v47  ;;  %v1219_v53 = vadd.f32 %v1218_v49, %v1217_v45  ;;  %v1285_v63 = vmul.f32 %v1865_v47, %v1865_v47  ;;  %v1222_v5 = vsel %vm1172_vm4, %v1865_v47, 0.0 }
 0x11a   : > { %1181 = vst.msk [vmem:[%s2166_s6 + $0x40] sm:$0xff] %vm1172_vm4, %v1866_v51  ;;  %v1220_v54 = vsel %vm1172_vm4, %v1866_v51, 0.0  ;;  %v1284_v0 = vmul.f32 %v1866_v51, %v1866_v51  ;;  %v1806_v1 = vpop.f32.mrb[10].mxu0 }
 0x11b   : > { %v1221_v2 = vadd.f32 %v1220_v54, %v1219_v53  ;;  %v1322_v3 = vadd.f32 %v1321_v62, %v1320_v52  ;;  %v1867_v4 = vadd.f32 %v1806_v1, %v2150_v56  ;;  %v1031_v55 = vpop.f32.mrb[11].mxu0  ;;  %v1325_v10 = vsel %vm1172_vm4, %v1285_v63, 0.0 }
 0x11c   : > { %v1323_v6 = vsel %vm1172_vm4, %v1284_v0, 0.0  ;;  %v1868_v7 = vadd.f32 %v1031_v55, %v2152_v57 }
 0x11d   : > { %v1324_v8 = vadd.f32 %v1323_v6, %v1322_v3  ;;  %1184 = vst.msk [vmem:[%s2166_s6 + $0x58] sm:$0xff] %vm1172_vm4, %v1867_v4  ;;  %v1223_v9 = vadd.f32 %v1222_v5, %v1221_v2  ;;  %v1287_v11 = vmul.f32 %v1867_v4, %v1867_v4  ;;  %v1226_v17 = vsel %vm1172_vm4, %v1867_v4, 0.0 }
 0x11e   : > { %1183 = vst.msk [vmem:[%s2166_s6 + $0x50] sm:$0xff] %vm1172_vm4, %v1868_v7  ;;  %v1224_v56 = vsel %vm1172_vm4, %v1868_v7, 0.0  ;;  %v1286_v12 = vmul.f32 %v1868_v7, %v1868_v7  ;;  %v1809_v13 = vpop.f32.mrb[12].mxu0 }
 0x11f   : > { %v1225_v14 = vadd.f32 %v1224_v56, %v1223_v9  ;;  %v1326_v15 = vadd.f32 %v1325_v10, %v1324_v8  ;;  %v1869_v16 = vadd.f32 %v1809_v13, %v2154_v58  ;;  %v1041_v57 = vpop.f32.mrb[13].mxu0  ;;  %v1329_v22 = vsel %vm1172_vm4, %v1287_v11, 0.0 }
 0x120   : > { %v1327_v18 = vsel %vm1172_vm4, %v1286_v12, 0.0  ;;  %v1870_v19 = vadd.f32 %v1041_v57, %v2156_v59 }
 0x121   : > { %v1328_v20 = vadd.f32 %v1327_v18, %v1326_v15  ;;  %1186 = vst.msk [vmem:[%s2166_s6 + $0x68] sm:$0xff] %vm1172_vm4, %v1869_v16  ;;  %v1227_v21 = vadd.f32 %v1226_v17, %v1225_v14  ;;  %v1289_v23 = vmul.f32 %v1869_v16, %v1869_v16  ;;  %v1230_v29 = vsel %vm1172_vm4, %v1869_v16, 0.0 }
 0x122   : > { %1185 = vst.msk [vmem:[%s2166_s6 + $0x60] sm:$0xff] %vm1172_vm4, %v1870_v19  ;;  %v1228_v58 = vsel %vm1172_vm4, %v1870_v19, 0.0  ;;  %v1288_v24 = vmul.f32 %v1870_v19, %v1870_v19  ;;  %v1812_v25 = vpop.f32.mrb[14].mxu0 }
 0x123   : > { %v1229_v26 = vadd.f32 %v1228_v58, %v1227_v21  ;;  %v1330_v27 = vadd.f32 %v1329_v22, %v1328_v20  ;;  %v1871_v28 = vadd.f32 %v1812_v25, %v2158_v60  ;;  %v1051_v59 = vpop.f32.mrb[15].mxu0  ;;  %v1333_v34 = vsel %vm1172_vm4, %v1289_v23, 0.0 }
 0x124   : > { %v1331_v30 = vsel %vm1172_vm4, %v1288_v24, 0.0  ;;  %v1872_v31 = vadd.f32 %v1051_v59, %v2160_v61 }
 0x125   : > { %v1332_v32 = vadd.f32 %v1331_v30, %v1330_v27  ;;  %1188 = vst.msk [vmem:[%s2166_s6 + $0x78] sm:$0xff] %vm1172_vm4, %v1871_v28  ;;  %v1231_v33 = vadd.f32 %v1230_v29, %v1229_v26  ;;  %v1291_v35 = vmul.f32 %v1871_v28, %v1871_v28  ;;  %v1234_v43 = vsel %vm1172_vm4, %v1871_v28, 0.0 }
 0x126   : > { %1187 = vst.msk [vmem:[%s2166_s6 + $0x70] sm:$0xff] %vm1172_vm4, %v1872_v31  ;;  %v1232_v36 = vsel %vm1172_vm4, %v1872_v31, 0.0  ;;  %v1290_v60 = vmul.f32 %v1872_v31, %v1872_v31  ;;  %v1763_v37 = vpop.f32.mrb[16].mxu1  ;;  %v1815_v38 = vpop.f32.mrb[16].mxu0 }
 0x127   : > { %v1233_v39 = vadd.f32 %v1232_v36, %v1231_v33  ;;  %v1334_v40 = vadd.f32 %v1333_v34, %v1332_v32  ;;  %v1873_v41 = vadd.f32 %v1815_v38, %v1763_v37  ;;  %v702_v61 = vpop.f32.mrb[17].mxu1  ;;  %v1061_v42 = vpop.f32.mrb[17].mxu0  ;;  %v1337_v48 = vsel %vm1172_vm4, %v1291_v35, 0.0 }
 0x128   : > { %v1335_v44 = vsel %vm1172_vm4, %v1290_v60, 0.0  ;;  %v1874_v45 = vadd.f32 %v1061_v42, %v702_v61 }
 0x129   : > { %v1336_v46 = vadd.f32 %v1335_v44, %v1334_v40  ;;  %1190 = vst.msk [vmem:[%s2166_s6 + $0x88] sm:$0xff] %vm1172_vm4, %v1873_v41  ;;  %v1235_v47 = vadd.f32 %v1234_v43, %v1233_v39  ;;  %v1293_v49 = vmul.f32 %v1873_v41, %v1873_v41  ;;  %v1238_v2 = vsel %vm1172_vm4, %v1873_v41, 0.0 }
 0x12a   : > { %1189 = vst.msk [vmem:[%s2166_s6 + $0x80] sm:$0xff] %vm1172_vm4, %v1874_v45  ;;  %v1236_v50 = vsel %vm1172_vm4, %v1874_v45, 0.0  ;;  %v1292_v51 = vmul.f32 %v1874_v45, %v1874_v45  ;;  %v1766_v52 = vpop.f32.mrb[18].mxu1  ;;  %v1818_v53 = vpop.f32.mrb[18].mxu0 }
 0x12b   : > { %v1237_v62 = vadd.f32 %v1236_v50, %v1235_v47  ;;  %v1338_v63 = vadd.f32 %v1337_v48, %v1336_v46  ;;  %v1875_v54 = vadd.f32 %v1818_v53, %v1766_v52  ;;  %v712_v0 = vpop.f32.mrb[19].mxu1  ;;  %v1071_v1 = vpop.f32.mrb[19].mxu0  ;;  %v1341_v6 = vsel %vm1172_vm4, %v1293_v49, 0.0 }
 0x12c   : > { %v1339_v3 = vsel %vm1172_vm4, %v1292_v51, 0.0  ;;  %v1876_v4 = vadd.f32 %v1071_v1, %v712_v0 }
 0x12d   : > { %v1340_v55 = vadd.f32 %v1339_v3, %v1338_v63  ;;  %1192 = vst.msk [vmem:[%s2166_s6 + $0x98] sm:$0xff] %vm1172_vm4, %v1875_v54  ;;  %v1239_v5 = vadd.f32 %v1238_v2, %v1237_v62  ;;  %v1295_v7 = vmul.f32 %v1875_v54, %v1875_v54  ;;  %v1242_v16 = vsel %vm1172_vm4, %v1875_v54, 0.0 }
 0x12e   : > { %1191 = vst.msk [vmem:[%s2166_s6 + $0x90] sm:$0xff] %vm1172_vm4, %v1876_v4  ;;  %v1240_v8 = vsel %vm1172_vm4, %v1876_v4, 0.0  ;;  %v1294_v9 = vmul.f32 %v1876_v4, %v1876_v4  ;;  %v1769_v10 = vpop.f32.mrb[20].mxu1  ;;  %v1821_v11 = vpop.f32.mrb[20].mxu0 }
 0x12f   : > { %v1241_v56 = vadd.f32 %v1240_v8, %v1239_v5  ;;  %v1342_v12 = vadd.f32 %v1341_v6, %v1340_v55  ;;  %v1877_v13 = vadd.f32 %v1821_v11, %v1769_v10  ;;  %v722_v14 = vpop.f32.mrb[21].mxu1  ;;  %v1081_v15 = vpop.f32.mrb[21].mxu0  ;;  %v1345_v20 = vsel %vm1172_vm4, %v1295_v7, 0.0 }
 0x130   : > { %v1343_v57 = vsel %vm1172_vm4, %v1294_v9, 0.0  ;;  %v1878_v17 = vadd.f32 %v1081_v15, %v722_v14 }
 0x131   : > { %v1344_v18 = vadd.f32 %v1343_v57, %v1342_v12  ;;  %1194 = vst.msk [vmem:[%s2166_s6 + $0xa8] sm:$0xff] %vm1172_vm4, %v1877_v13  ;;  %v1243_v19 = vadd.f32 %v1242_v16, %v1241_v56  ;;  %v1297_v21 = vmul.f32 %v1877_v13, %v1877_v13  ;;  %v1246_v29 = vsel %vm1172_vm4, %v1877_v13, 0.0 }
 0x132   : > { %1193 = vst.msk [vmem:[%s2166_s6 + $0xa0] sm:$0xff] %vm1172_vm4, %v1878_v17  ;;  %v1244_v22 = vsel %vm1172_vm4, %v1878_v17, 0.0  ;;  %v1296_v23 = vmul.f32 %v1878_v17, %v1878_v17  ;;  %v1772_v58 = vpop.f32.mrb[22].mxu1  ;;  %v1824_v24 = vpop.f32.mrb[22].mxu0 }
 0x133   : > { %v1245_v25 = vadd.f32 %v1244_v22, %v1243_v19  ;;  %v1346_v26 = vadd.f32 %v1345_v20, %v1344_v18  ;;  %v1879_v27 = vadd.f32 %v1824_v24, %v1772_v58  ;;  %v732_v28 = vpop.f32.mrb[23].mxu1  ;;  %v1091_v59 = vpop.f32.mrb[23].mxu0  ;;  %v1349_v34 = vsel %vm1172_vm4, %v1297_v21, 0.0 }
 0x134   : > { %v1347_v30 = vsel %vm1172_vm4, %v1296_v23, 0.0  ;;  %v1880_v31 = vadd.f32 %v1091_v59, %v732_v28 }
 0x135   : > { %v1348_v32 = vadd.f32 %v1347_v30, %v1346_v26  ;;  %1196 = vst.msk [vmem:[%s2166_s6 + $0xb8] sm:$0xff] %vm1172_vm4, %v1879_v27  ;;  %v1247_v33 = vadd.f32 %v1246_v29, %v1245_v25  ;;  %v1299_v35 = vmul.f32 %v1879_v27, %v1879_v27  ;;  %v1250_v43 = vsel %vm1172_vm4, %v1879_v27, 0.0 }
 0x136   : > { %1195 = vst.msk [vmem:[%s2166_s6 + $0xb0] sm:$0xff] %vm1172_vm4, %v1880_v31  ;;  %v1248_v36 = vsel %vm1172_vm4, %v1880_v31, 0.0  ;;  %v1298_v60 = vmul.f32 %v1880_v31, %v1880_v31  ;;  %v1775_v37 = vpop.f32.mrb[24].mxu1  ;;  %v1827_v38 = vpop.f32.mrb[24].mxu0 }
 0x137   : > { %v1249_v39 = vadd.f32 %v1248_v36, %v1247_v33  ;;  %v1350_v40 = vadd.f32 %v1349_v34, %v1348_v32  ;;  %v1881_v41 = vadd.f32 %v1827_v38, %v1775_v37  ;;  %v742_v61 = vpop.f32.mrb[25].mxu1  ;;  %v1101_v42 = vpop.f32.mrb[25].mxu0  ;;  %v1353_v48 = vsel %vm1172_vm4, %v1299_v35, 0.0 }
 0x138   : > { %v1351_v44 = vsel %vm1172_vm4, %v1298_v60, 0.0  ;;  %v1882_v45 = vadd.f32 %v1101_v42, %v742_v61 }
 0x139   : > { %v1352_v46 = vadd.f32 %v1351_v44, %v1350_v40  ;;  %1198 = vst.msk [vmem:[%s2166_s6 + $0xc8] sm:$0xff] %vm1172_vm4, %v1881_v41  ;;  %v1251_v47 = vadd.f32 %v1250_v43, %v1249_v39  ;;  %v1301_v49 = vmul.f32 %v1881_v41, %v1881_v41  ;;  %v1254_v2 = vsel %vm1172_vm4, %v1881_v41, 0.0 }
 0x13a   : > { %1197 = vst.msk [vmem:[%s2166_s6 + $0xc0] sm:$0xff] %vm1172_vm4, %v1882_v45  ;;  %v1252_v50 = vsel %vm1172_vm4, %v1882_v45, 0.0  ;;  %v1300_v51 = vmul.f32 %v1882_v45, %v1882_v45  ;;  %v1778_v52 = vpop.f32.mrb[26].mxu1  ;;  %v1830_v53 = vpop.f32.mrb[26].mxu0 }
 0x13b   : > { %v1253_v62 = vadd.f32 %v1252_v50, %v1251_v47  ;;  %v1354_v63 = vadd.f32 %v1353_v48, %v1352_v46  ;;  %v1883_v54 = vadd.f32 %v1830_v53, %v1778_v52  ;;  %v752_v0 = vpop.f32.mrb[27].mxu1  ;;  %v1111_v1 = vpop.f32.mrb[27].mxu0  ;;  %v1357_v6 = vsel %vm1172_vm4, %v1301_v49, 0.0 }
 0x13c   : > { %v1355_v3 = vsel %vm1172_vm4, %v1300_v51, 0.0  ;;  %v1884_v4 = vadd.f32 %v1111_v1, %v752_v0 }
 0x13d   : > { %v1356_v55 = vadd.f32 %v1355_v3, %v1354_v63  ;;  %1200 = vst.msk [vmem:[%s2166_s6 + $0xd8] sm:$0xff] %vm1172_vm4, %v1883_v54  ;;  %v1255_v5 = vadd.f32 %v1254_v2, %v1253_v62  ;;  %v1303_v7 = vmul.f32 %v1883_v54, %v1883_v54  ;;  %v1258_v16 = vsel %vm1172_vm4, %v1883_v54, 0.0 }
 0x13e   : > { %1199 = vst.msk [vmem:[%s2166_s6 + $0xd0] sm:$0xff] %vm1172_vm4, %v1884_v4  ;;  %v1256_v8 = vsel %vm1172_vm4, %v1884_v4, 0.0  ;;  %v1302_v9 = vmul.f32 %v1884_v4, %v1884_v4  ;;  %v1781_v10 = vpop.f32.mrb[28].mxu1  ;;  %v1833_v11 = vpop.f32.mrb[28].mxu0 }
 0x13f   : > { %v1257_v56 = vadd.f32 %v1256_v8, %v1255_v5  ;;  %v1358_v12 = vadd.f32 %v1357_v6, %v1356_v55  ;;  %v1885_v13 = vadd.f32 %v1833_v11, %v1781_v10  ;;  %v762_v14 = vpop.f32.mrb[29].mxu1  ;;  %v1121_v15 = vpop.f32.mrb[29].mxu0  ;;  %v1361_v20 = vsel %vm1172_vm4, %v1303_v7, 0.0 }
 0x140   : > { %v1359_v57 = vsel %vm1172_vm4, %v1302_v9, 0.0  ;;  %v1886_v17 = vadd.f32 %v1121_v15, %v762_v14 }
 0x141   : > { %v1360_v18 = vadd.f32 %v1359_v57, %v1358_v12  ;;  %1202 = vst.msk [vmem:[%s2166_s6 + $0xe8] sm:$0xff] %vm1172_vm4, %v1885_v13  ;;  %v1259_v19 = vadd.f32 %v1258_v16, %v1257_v56  ;;  %v1305_v21 = vmul.f32 %v1885_v13, %v1885_v13  ;;  %v1262_v29 = vsel %vm1172_vm4, %v1885_v13, 0.0 }
 0x142   : > { %1201 = vst.msk [vmem:[%s2166_s6 + $0xe0] sm:$0xff] %vm1172_vm4, %v1886_v17  ;;  %v1260_v22 = vsel %vm1172_vm4, %v1886_v17, 0.0  ;;  %v1304_v23 = vmul.f32 %v1886_v17, %v1886_v17  ;;  %v1784_v58 = vpop.f32.mrb[30].mxu1  ;;  %v1836_v24 = vpop.f32.mrb[30].mxu0 }
 0x143   : > { %v1261_v25 = vadd.f32 %v1260_v22, %v1259_v19  ;;  %v1362_v26 = vadd.f32 %v1361_v20, %v1360_v18  ;;  %v1887_v27 = vadd.f32 %v1836_v24, %v1784_v58  ;;  %v772_v28 = vpop.f32.mrb[31].mxu1  ;;  %v1131_v59 = vpop.f32.mrb[31].mxu0  ;;  %v1365_v35 = vsel %vm1172_vm4, %v1305_v21, 0.0 }
 0x144   : > { %v1363_v30 = vsel %vm1172_vm4, %v1304_v23, 0.0  ;;  %v1888_v31 = vadd.f32 %v1131_v59, %v772_v28 }
 0x145   : > { %v1364_v32 = vadd.f32 %v1363_v30, %v1362_v26  ;;  %1204 = vst.msk [vmem:[%s2166_s6 + $0xf8] sm:$0xff] %vm1172_vm4, %v1887_v27  ;;  %v1307_v33 = vmul.f32 %v1887_v27, %v1887_v27  ;;  %v1263_v34 = vadd.f32 %v1262_v29, %v1261_v25  ;;  %v1266_v40 = vsel %vm1172_vm4, %v1887_v27, 0.0 }
 0x146   : > { %1203 = vst.msk [vmem:[%s2166_s6 + $0xf0] sm:$0xff] %vm1172_vm4, %v1888_v31  ;;  %v1264_v36 = vsel %vm1172_vm4, %v1888_v31, 0.0  ;;  %v1306_v60 = vmul.f32 %v1888_v31, %v1888_v31 }
 0x147   : > { %v1369_v37 = vsel %vm1172_vm4, %v1307_v33, 0.0  ;;  %v1265_v38 = vadd.f32 %v1264_v36, %v1263_v34  ;;  %v1366_v39 = vadd.f32 %v1365_v35, %v1364_v32 }
 0x148   : > { %v1367_v41 = vsel %vm1172_vm4, %v1306_v60, 0.0 }
 0x149   : > { %v1267_v61 = vadd.f32 %v1266_v40, %v1265_v38  ;;  %v1368_v42 = vadd.f32 %v1367_v41, %v1366_v39 }
 0x14b   : > { %v1268_v43 = vrot.slane %v1267_v61, 4  ;;  %v1370_v44 = vadd.f32 %v1369_v37, %v1368_v42 }
 0x14d   : > { %v1269_v45 = vadd.f32 %v1268_v43, %v1267_v61  ;;  %v1371_v46 = vrot.slane %v1370_v44, 4 }
 0x14f   : > { %v1270_v47 = vrot.slane %v1269_v45, 2  ;;  %v1372_v48 = vadd.f32 %v1371_v46, %v1370_v44 }
 0x151   : > { %v1271_v49 = vadd.f32 %v1270_v47, %v1269_v45  ;;  %v1373_v50 = vrot.slane %v1372_v48, 2 }
 0x153   : > { %v1272_v51 = vrot.slane %v1271_v49, 1  ;;  %v1374_v52 = vadd.f32 %v1373_v50, %v1372_v48 }
 0x155   : > { %v1273_v53 = vadd.f32 %v1272_v51, %v1271_v49  ;;  %v1375_v62 = vrot.slane %v1374_v52, 1 }
 0x157   : > { %1275 = vst.msk [vmem:[%s181_s10] sm:$0x1] %vm1274_vm5, %v1273_v53  ;;  %v1376_v63 = vadd.f32 %v1375_v62, %v1374_v52 }
 0x159   : > { %1377 = vst.msk [vmem:[%s181_s10 + $0x1] sm:$0x1] %vm1274_vm5, %v1376_v63 }
 0x15a PF: > { %s14_s12 = sadd.s32 1, %s1937_s12  }
 0x15b   : > { %p11_p4 = scmp.ge.s32.totalorder %s14_s12, 4  }
 0x15d   :  { %13 = sbr.rel (!%p11_p4) target bundleno = 1 (0x1), region = 72 }

</bundles_post_ra>
